<compile_context>
chip_gen: v7x
topology: tpu7x:2x2x1
jax: 0.10.0
libtpu: 0.0.40
codegen_flags: <defaults>
</compile_context>

<pallas_src>
import math

import jax
import jax.numpy as jnp
from jax.experimental import pallas as pl
from jax.experimental.pallas import tpu as pltpu

BN_EPS = 1e-5


def simsiam_kernel(h_ref,
                   w1_ref, b1_ref,      # projection layer1 (Linear+BN folded) + ReLU
                   w2_ref, b2_ref,      # projection layer3 (Linear+BN folded)       -> p
                   w3_ref, b3_ref,      # predictor  layer1 (Linear+BN folded) + ReLU
                   w4_ref, b4_ref,      # predictor  layer2 (Linear only)            -> z
                   p_ref, z_ref):
    # bf16 operands on the MXU, f32 accumulation, f32 elementwise epilogue.
    h = h_ref[...]                                                      # [TM, D] bf16

    a1 = jnp.dot(h, w1_ref[...], preferred_element_type=jnp.float32) + b1_ref[...]
    a1 = jnp.maximum(a1, 0.0)                                           # [TM, PROJ] f32

    p = jnp.dot(a1.astype(w2_ref.dtype), w2_ref[...],
                preferred_element_type=jnp.float32) + b2_ref[...]       # [TM, CLU] f32
    p_ref[...] = p.astype(p_ref.dtype)

    a2 = jnp.dot(p.astype(w3_ref.dtype), w3_ref[...],
                 preferred_element_type=jnp.float32) + b3_ref[...]
    a2 = jnp.maximum(a2, 0.0)                                           # [TM, PRED] f32

    z = jnp.dot(a2.astype(w4_ref.dtype), w4_ref[...],
                preferred_element_type=jnp.float32) + b4_ref[...]       # [TM, CLU] f32
    z_ref[...] = z.astype(z_ref.dtype)


def fold_linear_bn(w, b, gamma, beta, mean, var, eps=BN_EPS):
    """Fold inference-mode BatchNorm1d into the preceding Linear."""
    s = gamma / jnp.sqrt(var + eps)                 # [H]
    w_f = w * s[None, :]
    b_f = b * s + (beta - mean * s)
    return w_f, b_f.reshape(1, -1)


def _folded_operands(params):
    """Fold BN into the Linears, cast matmul operands to bf16 (hoisted constant work)."""
    w1, b1 = fold_linear_bn(params["proj_w1"], params["proj_b1"],
                            params["proj_bn1_gamma"], params["proj_bn1_beta"],
                            params["proj_bn1_mean"], params["proj_bn1_var"])
    w2, b2 = fold_linear_bn(params["proj_w3"], params["proj_b3"],
                            params["proj_bn3_gamma"], params["proj_bn3_beta"],
                            params["proj_bn3_mean"], params["proj_bn3_var"])
    w3, b3 = fold_linear_bn(params["pred_w1"], params["pred_b1"],
                            params["pred_bn1_gamma"], params["pred_bn1_beta"],
                            params["pred_bn1_mean"], params["pred_bn1_var"])
    w4 = params["pred_w2"]
    b4 = params["pred_b2"].reshape(1, -1)
    bf = jnp.bfloat16
    return ((w1.astype(bf), b1), (w2.astype(bf), b2),
            (w3.astype(bf), b3), (w4.astype(bf), b4))


def simsiam_forward(h, params, *, tile_m=64):
    B, D = h.shape
    tile_m = min(tile_m, B)
    assert B % tile_m == 0, "batch must be divisible by the batch tile"

    (w1, b1), (w2, b2), (w3, b3), (w4, b4) = _folded_operands(params)
    hb = h.astype(jnp.bfloat16)

    PROJ = w1.shape[1]
    CLU = w2.shape[1]
    PRED = w3.shape[1]

    grid = (B // tile_m,)
    const = lambda i: (0, 0)       # weights / biases resident across batch tiles
    row = lambda i: (i, 0)         # batch-tiled streams

    in_specs = [
        pl.BlockSpec((tile_m, D), row),
        pl.BlockSpec(w1.shape, const), pl.BlockSpec(b1.shape, const),
        pl.BlockSpec(w2.shape, const), pl.BlockSpec(b2.shape, const),
        pl.BlockSpec(w3.shape, const), pl.BlockSpec(b3.shape, const),
        pl.BlockSpec(w4.shape, const), pl.BlockSpec(b4.shape, const),
    ]
    out_specs = (pl.BlockSpec((tile_m, CLU), row),
                 pl.BlockSpec((tile_m, CLU), row))
    out_shape = (jax.ShapeDtypeStruct((B, CLU), jnp.float32),
                 jax.ShapeDtypeStruct((B, CLU), jnp.float32))

    flops = 2 * B * (D * PROJ + PROJ * CLU + CLU * PRED + PRED * CLU)
    bytes_accessed = (hb.size * 2
                      + sum(int(w.size) * 2 for w in (w1, w2, w3, w4))
                      + sum(int(b.size) * 4 for b in (b1, b2, b3, b4))
                      + B * (CLU + CLU) * 4)

    return pl.pallas_call(
        simsiam_kernel,
        grid=grid,
        in_specs=in_specs,
        out_specs=out_specs,
        out_shape=out_shape,
        compiler_params=pltpu.CompilerParams(
            dimension_semantics=("parallel",),       # v7x megacore; harmless elsewhere
            vmem_limit_bytes=32 * 1024 * 1024),      # safe on v5e/v6e/v7x
        cost_estimate=pl.CostEstimate(flops=flops, transcendentals=0,
                                      bytes_accessed=bytes_accessed),
    )(hb, w1, b1, w2, b2, w3, b3, w4, b4)


# ----------------------- pure-JAX references -----------------------

def simsiam_reference_bf16(h, params):
    """Mirrors the kernel math exactly (BN fold + bf16 MXU operands, f32 accum)."""
    (w1, b1), (w2, b2), (w3, b3), (w4, b4) = _folded_operands(params)
    hb = h.astype(jnp.bfloat16)
    a1 = jnp.maximum(jnp.dot(hb, w1, preferred_element_type=jnp.float32) + b1, 0.0)
    p = jnp.dot(a1.astype(jnp.bfloat16), w2, preferred_element_type=jnp.float32) + b2
    a2 = jnp.maximum(jnp.dot(p.astype(jnp.bfloat16), w3,
                             preferred_element_type=jnp.float32) + b3, 0.0)
    z = jnp.dot(a2.astype(jnp.bfloat16), w4, preferred_element_type=jnp.float32) + b4
    return p, z


def simsiam_reference_f32(h, params, eps=BN_EPS):
    """Torch-faithful f32 reference (explicit Linear then inference-mode BN)."""
    def bn(x, g, b, m, v):
        return (x - m) / jnp.sqrt(v + eps) * g + b

    a1 = jax.nn.relu(bn(h @ params["proj_w1"] + params["proj_b1"],
                        params["proj_bn1_gamma"], params["proj_bn1_beta"],
                        params["proj_bn1_mean"], params["proj_bn1_var"]))
    p = bn(a1 @ params["proj_w3"] + params["proj_b3"],
           params["proj_bn3_gamma"], params["proj_bn3_beta"],
           params["proj_bn3_mean"], params["proj_bn3_var"])
    a2 = jax.nn.relu(bn(p @ params["pred_w1"] + params["pred_b1"],
                        params["pred_bn1_gamma"], params["pred_bn1_beta"],
                        params["pred_bn1_mean"], params["pred_bn1_var"]))
    z = a2 @ params["pred_w2"] + params["pred_b2"]
    return p, z


if __name__ == "__main__":
    # SimSiamModule hyper-params (small, consistent with the forward):
    B = 128        # batch
    IN = 32        # args.hidden_dim (projection input)
    PROJ = 64      # args.projection_dim
    CLU = 32       # args.cluster_hidden_dim (p and z dimension)
    PRED = 16      # args.prediction_hidden_dim

    key = jax.random.PRNGKey(0)
    ks = jax.random.split(key, 22)

    def linear_init(kw, kb, fan_in, fan_out):
        bound = 1.0 / math.sqrt(fan_in)
        w = jax.random.uniform(kw, (fan_in, fan_out), jnp.float32, -bound, bound)
        b = jax.random.uniform(kb, (fan_out,), jnp.float32, -bound, bound)
        return w, b

    def bn_init(kg, kb, km, kv, dim):
        gamma = 1.0 + 0.1 * jax.random.normal(kg, (dim,), jnp.float32)
        beta = 0.1 * jax.random.normal(kb, (dim,), jnp.float32)
        mean = 0.1 * jax.random.normal(km, (dim,), jnp.float32)
        var = 1.0 + 0.1 * jax.random.uniform(kv, (dim,), jnp.float32)
        return gamma, beta, mean, var

    pw1, pb1 = linear_init(ks[0], ks[1], IN, PROJ)
    pw3, pb3 = linear_init(ks[2], ks[3], PROJ, CLU)
    qw1, qb1 = linear_init(ks[4], ks[5], CLU, PRED)
    qw2, qb2 = linear_init(ks[6], ks[7], PRED, CLU)
    g1, be1, m1, v1 = bn_init(ks[8], ks[9], ks[10], ks[11], PROJ)
    g3, be3, m3, v3 = bn_init(ks[12], ks[13], ks[14], ks[15], CLU)
    gq, beq, mq, vq = bn_init(ks[16], ks[17], ks[18], ks[19], PRED)

    params = {
        "proj_w1": pw1, "proj_b1": pb1,
        "proj_bn1_gamma": g1, "proj_bn1_beta": be1, "proj_bn1_mean": m1, "proj_bn1_var": v1,
        "proj_w3": pw3, "proj_b3": pb3,
        "proj_bn3_gamma": g3, "proj_bn3_beta": be3, "proj_bn3_mean": m3, "proj_bn3_var": v3,
        "pred_w1": qw1, "pred_b1": qb1,
        "pred_bn1_gamma": gq, "pred_bn1_beta": beq, "pred_bn1_mean": mq, "pred_bn1_var": vq,
        "pred_w2": qw2, "pred_b2": qb2,
    }

    h = jax.random.normal(ks[20], (B, IN), jnp.float32)

    p, z = simsiam_forward(h, params, tile_m=64)
    p = jax.block_until_ready(p)
    z = jax.block_until_ready(z)
    assert p.shape == (B, CLU) and z.shape == (B, CLU)

    # Tight check against a reference that mirrors the kernel math exactly.
    p_m, z_m = simsiam_reference_bf16(h, params)
    assert jnp.allclose(p, p_m, atol=1e-3, rtol=1e-3), "p mismatch vs mirrored reference"
    assert jnp.allclose(z, z_m, atol=1e-3, rtol=1e-3), "z mismatch vs mirrored reference"

    # Loose sanity check against the full-f32 torch-faithful reference
    # (tolerance accounts for bf16 MXU operands).
    p_r, z_r = simsiam_reference_f32(h, params)
    assert jnp.allclose(p, p_r, atol=1e-1, rtol=1e-1), "p mismatch vs f32 reference"
    assert jnp.allclose(z, z_r, atol=1e-1, rtol=1e-1), "z mismatch vs f32 reference"

    print("KERNEL_OK")
</pallas_src>

<mosaic_0001>
module attributes {stable_mosaic.version = 11 : i64} {
  func.func @simsiam_kernel(%arg0: i32, %arg1: memref<64x32xbf16, #tpu.memory_space<vmem>>, %arg2: memref<32x64xbf16, #tpu.memory_space<vmem>>, %arg3: memref<1x64xf32, #tpu.memory_space<vmem>>, %arg4: memref<64x32xbf16, #tpu.memory_space<vmem>>, %arg5: memref<1x32xf32, #tpu.memory_space<vmem>>, %arg6: memref<32x16xbf16, #tpu.memory_space<vmem>>, %arg7: memref<1x16xf32, #tpu.memory_space<vmem>>, %arg8: memref<16x32xbf16, #tpu.memory_space<vmem>>, %arg9: memref<1x32xf32, #tpu.memory_space<vmem>>, %arg10: memref<64x32xf32, #tpu.memory_space<vmem>>, %arg11: memref<64x32xf32, #tpu.memory_space<vmem>>) attributes {dimension_semantics = [#tpu.dimension_semantics<parallel>], iteration_bounds = array<i64: 2>, scalar_prefetch = 0 : i64, scratch_operands = 0 : i64, tpu.core_type = #tpu.core_type<tc>, window_params = [{transform_indices = @transform_0, window_bounds = array<i64: 64, 32>}, {pipeline_mode = #tpu.pipeline_mode<synchronous>, transform_indices = @transform_1, window_bounds = array<i64: 32, 64>}, {pipeline_mode = #tpu.pipeline_mode<synchronous>, transform_indices = @transform_2, window_bounds = array<i64: 1, 64>}, {pipeline_mode = #tpu.pipeline_mode<synchronous>, transform_indices = @transform_3, window_bounds = array<i64: 64, 32>}, {pipeline_mode = #tpu.pipeline_mode<synchronous>, transform_indices = @transform_4, window_bounds = array<i64: 1, 32>}, {pipeline_mode = #tpu.pipeline_mode<synchronous>, transform_indices = @transform_5, window_bounds = array<i64: 32, 16>}, {pipeline_mode = #tpu.pipeline_mode<synchronous>, transform_indices = @transform_6, window_bounds = array<i64: 1, 16>}, {pipeline_mode = #tpu.pipeline_mode<synchronous>, transform_indices = @transform_7, window_bounds = array<i64: 16, 32>}, {pipeline_mode = #tpu.pipeline_mode<synchronous>, transform_indices = @transform_8, window_bounds = array<i64: 1, 32>}, {transform_indices = @transform_9, window_bounds = array<i64: 64, 32>}, {transform_indices = @transform_10, window_bounds = array<i64: 64, 32>}]} {
    %c0 = arith.constant 0 : index
    %c0_0 = arith.constant 0 : index
    %0 = vector.load %arg1[%c0, %c0_0] : memref<64x32xbf16, #tpu.memory_space<vmem>>, vector<64x32xbf16>
    %c0_1 = arith.constant 0 : index
    %c0_2 = arith.constant 0 : index
    %1 = vector.load %arg2[%c0_1, %c0_2] : memref<32x64xbf16, #tpu.memory_space<vmem>>, vector<32x64xbf16>
    %cst = arith.constant dense<0.000000e+00> : vector<64x64xf32>
    %2 = tpu.matmul %0, %1, %cst {dimension_numbers = #tpu.dot_dimension_numbers<[1], [0], [0], [1], [0, 0, 1, 1], [], []>} : vector<64x32xbf16>, vector<32x64xbf16>, vector<64x64xf32> -> vector<64x64xf32>
    %c0_3 = arith.constant 0 : index
    %c0_4 = arith.constant 0 : index
    %3 = vector.load %arg3[%c0_3, %c0_4] : memref<1x64xf32, #tpu.memory_space<vmem>>, vector<1x64xf32>
    %4 = vector.broadcast %3 : vector<1x64xf32> to vector<64x64xf32>
    %5 = arith.addf %2, %4 : vector<64x64xf32>
    %cst_5 = arith.constant 0.000000e+00 : f32
    %6 = vector.broadcast %cst_5 : f32 to vector<64x64xf32>
    %7 = arith.maximumf %5, %6 : vector<64x64xf32>
    %8 = arith.truncf %7 : vector<64x64xf32> to vector<64x64xbf16>
    %c0_6 = arith.constant 0 : index
    %c0_7 = arith.constant 0 : index
    %9 = vector.load %arg4[%c0_6, %c0_7] : memref<64x32xbf16, #tpu.memory_space<vmem>>, vector<64x32xbf16>
    %cst_8 = arith.constant dense<0.000000e+00> : vector<64x32xf32>
    %10 = tpu.matmul %8, %9, %cst_8 {dimension_numbers = #tpu.dot_dimension_numbers<[1], [0], [0], [1], [0, 0, 1, 1], [], []>} : vector<64x64xbf16>, vector<64x32xbf16>, vector<64x32xf32> -> vector<64x32xf32>
    %c0_9 = arith.constant 0 : index
    %c0_10 = arith.constant 0 : index
    %11 = vector.load %arg5[%c0_9, %c0_10] : memref<1x32xf32, #tpu.memory_space<vmem>>, vector<1x32xf32>
    %12 = vector.broadcast %11 : vector<1x32xf32> to vector<64x32xf32>
    %13 = arith.addf %10, %12 : vector<64x32xf32>
    %c0_11 = arith.constant 0 : index
    %c0_12 = arith.constant 0 : index
    %14 = vector.load %arg10[%c0_11, %c0_12] : memref<64x32xf32, #tpu.memory_space<vmem>>, vector<64x32xf32>
    tpu.vector_store %arg10[%c0_11, %c0_12], %13 {strides = array<i32>} : memref<64x32xf32, #tpu.memory_space<vmem>>, vector<64x32xf32>,
    %15 = arith.truncf %13 : vector<64x32xf32> to vector<64x32xbf16>
    %c0_13 = arith.constant 0 : index
    %c0_14 = arith.constant 0 : index
    %16 = vector.load %arg6[%c0_13, %c0_14] : memref<32x16xbf16, #tpu.memory_space<vmem>>, vector<32x16xbf16>
    %cst_15 = arith.constant dense<0.000000e+00> : vector<64x16xf32>
    %17 = tpu.matmul %15, %16, %cst_15 {dimension_numbers = #tpu.dot_dimension_numbers<[1], [0], [0], [1], [0, 0, 1, 1], [], []>} : vector<64x32xbf16>, vector<32x16xbf16>, vector<64x16xf32> -> vector<64x16xf32>
    %c0_16 = arith.constant 0 : index
    %c0_17 = arith.constant 0 : index
    %18 = vector.load %arg7[%c0_16, %c0_17] : memref<1x16xf32, #tpu.memory_space<vmem>>, vector<1x16xf32>
    %19 = vector.broadcast %18 : vector<1x16xf32> to vector<64x16xf32>
    %20 = arith.addf %17, %19 : vector<64x16xf32>
    %cst_18 = arith.constant 0.000000e+00 : f32
    %21 = vector.broadcast %cst_18 : f32 to vector<64x16xf32>
    %22 = arith.maximumf %20, %21 : vector<64x16xf32>
    %23 = arith.truncf %22 : vector<64x16xf32> to vector<64x16xbf16>
    %c0_19 = arith.constant 0 : index
    %c0_20 = arith.constant 0 : index
    %24 = vector.load %arg8[%c0_19, %c0_20] : memref<16x32xbf16, #tpu.memory_space<vmem>>, vector<16x32xbf16>
    %cst_21 = arith.constant dense<0.000000e+00> : vector<64x32xf32>
    %25 = tpu.matmul %23, %24, %cst_21 {dimension_numbers = #tpu.dot_dimension_numbers<[1], [0], [0], [1], [0, 0, 1, 1], [], []>} : vector<64x16xbf16>, vector<16x32xbf16>, vector<64x32xf32> -> vector<64x32xf32>
    %c0_22 = arith.constant 0 : index
    %c0_23 = arith.constant 0 : index
    %26 = vector.load %arg9[%c0_22, %c0_23] : memref<1x32xf32, #tpu.memory_space<vmem>>, vector<1x32xf32>
    %27 = vector.broadcast %26 : vector<1x32xf32> to vector<64x32xf32>
    %28 = arith.addf %25, %27 : vector<64x32xf32>
    %c0_24 = arith.constant 0 : index
    %c0_25 = arith.constant 0 : index
    %29 = vector.load %arg11[%c0_24, %c0_25] : memref<64x32xf32, #tpu.memory_space<vmem>>, vector<64x32xf32>
    tpu.vector_store %arg11[%c0_24, %c0_25], %28 {strides = array<i32>} : memref<64x32xf32, #tpu.memory_space<vmem>>, vector<64x32xf32>,
    return
  }
  func.func @transform_0(%arg0: i32) -> (i32, i32) {
    %c0_i32 = arith.constant 0 : i32
    %c0_i32_0 = arith.constant 0 : i32
    return %arg0, %c0_i32 : i32, i32
  }
  func.func @transform_1(%arg0: i32) -> (i32, i32) {
    %c0_i32 = arith.constant 0 : i32
    %c0_i32_0 = arith.constant 0 : i32
    %c0_i32_1 = arith.constant 0 : i32
    return %c0_i32, %c0_i32_0 : i32, i32
  }
  func.func @transform_2(%arg0: i32) -> (i32, i32) {
    %c0_i32 = arith.constant 0 : i32
    %c0_i32_0 = arith.constant 0 : i32
    %c0_i32_1 = arith.constant 0 : i32
    return %c0_i32, %c0_i32_0 : i32, i32
  }
  func.func @transform_3(%arg0: i32) -> (i32, i32) {
    %c0_i32 = arith.constant 0 : i32
    %c0_i32_0 = arith.constant 0 : i32
    %c0_i32_1 = arith.constant 0 : i32
    return %c0_i32, %c0_i32_0 : i32, i32
  }
  func.func @transform_4(%arg0: i32) -> (i32, i32) {
    %c0_i32 = arith.constant 0 : i32
    %c0_i32_0 = arith.constant 0 : i32
    %c0_i32_1 = arith.constant 0 : i32
    return %c0_i32, %c0_i32_0 : i32, i32
  }
  func.func @transform_5(%arg0: i32) -> (i32, i32) {
    %c0_i32 = arith.constant 0 : i32
    %c0_i32_0 = arith.constant 0 : i32
    %c0_i32_1 = arith.constant 0 : i32
    return %c0_i32, %c0_i32_0 : i32, i32
  }
  func.func @transform_6(%arg0: i32) -> (i32, i32) {
    %c0_i32 = arith.constant 0 : i32
    %c0_i32_0 = arith.constant 0 : i32
    %c0_i32_1 = arith.constant 0 : i32
    return %c0_i32, %c0_i32_0 : i32, i32
  }
  func.func @transform_7(%arg0: i32) -> (i32, i32) {
    %c0_i32 = arith.constant 0 : i32
    %c0_i32_0 = arith.constant 0 : i32
    %c0_i32_1 = arith.constant 0 : i32
    return %c0_i32, %c0_i32_0 : i32, i32
  }
  func.func @transform_8(%arg0: i32) -> (i32, i32) {
    %c0_i32 = arith.constant 0 : i32
    %c0_i32_0 = arith.constant 0 : i32
    %c0_i32_1 = arith.constant 0 : i32
    return %c0_i32, %c0_i32_0 : i32, i32
  }
  func.func @transform_9(%arg0: i32) -> (i32, i32) {
    %c0_i32 = arith.constant 0 : i32
    %c0_i32_0 = arith.constant 0 : i32
    return %arg0, %c0_i32 : i32, i32
  }
  func.func @transform_10(%arg0: i32) -> (i32, i32) {
    %c0_i32 = arith.constant 0 : i32
    %c0_i32_0 = arith.constant 0 : i32
    return %arg0, %c0_i32 : i32, i32
  }
}

</mosaic_0001>

<bundles_post_ra>
// kernel: tpu_custom_call.1
= control target key start
LH: loop header
LB: loop body
LE: loop exit
PB: predicated region body
PF: predicated region fallthrough
CT: control target
= control target key end

     0   :  { %s1156_s13 = smov 0   ;;  %s1255_s0 = inlined_call_operand.vmem [shape: bf16[128,32], index: 0, kind: input, shape index: {}]   ;;  %s1256_s1 = inlined_call_operand.vmem [shape: bf16[32,64], index: 1, kind: input, shape index: {}]   ;;  %s1257_s2 = inlined_call_operand.vmem [shape: f32[1,64], index: 2, kind: input, shape index: {}]   ;;  %s1258_s3 = inlined_call_operand.vmem [shape: bf16[64,32], index: 3, kind: input, shape index: {}]   ;;  %s1259_s4 = inlined_call_operand.vmem [shape: f32[1,32], index: 4, kind: input, shape index: {}]   ;;  %s1260_s5 = inlined_call_operand.vmem [shape: bf16[32,16], index: 5, kind: input, shape index: {}]   ;;  %s1261_s6 = inlined_call_operand.vmem [shape: f32[1,16], index: 6, kind: input, shape index: {}]   ;;  %s1262_s7 = inlined_call_operand.vmem [shape: bf16[16,32], index: 7, kind: input, shape index: {}]   ;;  %s1263_s8 = inlined_call_operand.vmem [shape: f32[1,32], index: 8, kind: input, shape index: {}]   ;;  %s1264_s9 = inlined_call_operand.vmem [shape: f32[128,32], index: 9, kind: output, shape index: {0}]   ;;  %s1265_s10 = inlined_call_operand.vmem [shape: f32[128,32], index: 10, kind: output, shape index: {1}]  }
   0x1 LB: > { %s951_s14 = sadd.s32 4294967295, %s1099_s13   ;;  %p955_p0 = scmp.ge.s32.totalorder %s1099_s13, 1  ;;  %s1099_s13 = sphi %s1156_s13, %s21_s13  }
   0x2   : > { %p316_p1 = scmp.lt.s32.totalorder %s1099_s13, 3 }
   0x4   : > { %p317_p2 = pnand %p955_p0, %p316_p1 }
   0x5   : > { %v1080_v0 = vld [vmem:[%s1256_s1] sm:$0xff] (!%p317_p2)   ;;  %s956_s17 = sshll.u32 (!%p317_p2), %s951_s14, 3  ;;  %v1081_v1 = vld [vmem:[%s1256_s1 + $0x8] sm:$0xff] (!%p317_p2)   ;;  %vm429_vm0 = vcmask (!%p317_p2), 261120   ;;  %v1088_v8 = vld [vmem:[%s1258_s3 + $0x10] sm:$0xff] (!%p317_p2)   ;;  %vm558_vm1 = vcmask (!%p317_p2), 523264  }
   0x6   : > { %320 = sbr.rel (%p317_p2) target bundleno = 908 (0x38c), region = 56  ;;  %p360_p3 = scmp.lt.s32.totalorder (!%p317_p2), %s956_s17, 15  ;;  %1022 = vmatprep.subr.bf16.mxu0 (!%p317_p2), %v1080_v0  ;;  %v1086_v2 = vld [vmem:[%s1258_s3] sm:$0xff] (!%p317_p2)   ;;  %v1087_v3 = vld [vmem:[%s1258_s3 + $0x8] sm:$0xff] (!%p317_p2)   ;;  %v1089_v9 = vld [vmem:[%s1258_s3 + $0x18] sm:$0xff] (!%p317_p2)   ;;  %vm775_vm2 = vcmask (!%p317_p2), 130048  }
   0x7   : > { %1023 = vmatpush3.bf16.msra.mxu0 (!%p317_p2), %v1080_v0  ;;  %1034 = vmatprep.subr.bf16.mxu1 (!%p317_p2), %v1086_v2  ;;  %v1090_v10 = vld [vmem:[%s1260_s5] sm:$0xff] (!%p317_p2)   ;;  %v1091_v40 = vld [vmem:[%s1260_s5 + $0x8] sm:$0xff] (!%p317_p2)  }
   0x8   : > { %1024 = vmatprep.subr.bf16.mxu0 (!%p317_p2), %v1081_v1  ;;  %1035 = vmatpush3.bf16.msra.mxu1 (!%p317_p2), %v1086_v2  ;;  %v962_v11 = vld [vmem:[%s1257_s2] ss:$0 sm:$0xff] (!%p317_p2) }
   0x9   : > { %1036 = vmatprep.subr.bf16.mxu1 (!%p317_p2), %v1087_v3  ;;  %v1092_v41 = vld [vmem:[%s1262_s7] sm:$0xff] (!%p317_p2)  }
   0xa   : > { %v973_v42 = vld [vmem:[%s1259_s4] ss:$0 sm:$0xff] (!%p317_p2) }
   0xb   : > { %1025 = vmatpush3.bf16.msra.mxu0 (!%p317_p2), %v1081_v1  ;;  %v982_v63 = vld [vmem:[%s1261_s6] ss:$0 sm:$0xff] (!%p317_p2) }
   0xc   : > { %1037 = vmatpush3.bf16.msra.mxu1 (!%p317_p2), %v1087_v3  ;;  %1050 = vmatprep.subr.bf16.mxu0 (!%p317_p2), %v1090_v10 }
   0xd   : > { %s1267_s17 = smov (!%p360_p3, %s956_s17), 15  ;;  %1038 = vmatprep.subr.bf16.mxu1 %v1088_v8 }
   0xe   : > { %s957_s24 = sshll.u32 %s1267_s17, 2  ;;  %s959_s22 = sshll.u32 %s1267_s17, 3 }
   0xf   : > { %s363_s27 = scalar_lea.vmem %s1255_s0, %s957_s24  ;;  %s375_s15 = scalar_lea.vmem %s1265_s10, %s959_s22 }
  0x10   : > { %v1082_v4 = vld [vmem:[%s363_s27] sm:$0xff]   ;;  %v1083_v5 = vld [vmem:[%s363_s27 + $0x8] sm:$0xff]   ;;  %v1084_v6 = vld [vmem:[%s363_s27 + $0x10] sm:$0xff]   ;;  %1039 = vmatpush3.bf16.msra.mxu1 %v1088_v8 }
  0x11   : > { %1026 = vmatprep.mubr.msk.bf16.mxu0 %vm429_vm0, %v1082_v4  ;;  %v1085_v7 = vld [vmem:[%s363_s27 + $0x18] sm:$0xff]   ;;  %1040 = vmatprep.subr.bf16.mxu1 %v1089_v9  ;;  %s369_s27 = scalar_lea.vmem %s1264_s9, %s959_s22 }
  0x12   : > { %1027 = vmatmul.mubr.msk.bf16.vlgmr.msra.gmra.mrb[0].mxu0 %vm429_vm0, %v1083_v5 }
  0x13   : > { %1030 = vmatprep.mubr.msk.bf16.mxu0 %vm429_vm0, %v1084_v6  ;;  %1051 = vmatpush3.bf16.msra.mxu0 %v1090_v10 }
  0x14   : > { %1041 = vmatpush3.bf16.msra.mxu1 %v1089_v9  ;;  %1052 = vmatprep.subr.bf16.mxu0 %v1091_v40 }
  0x15   : > { %1062 = vmatprep.subr.bf16.mxu1 %v1092_v41 }
  0x17   : > { %1053 = vmatpush3.bf16.msra.mxu0 %v1091_v40 }
  0x1a   : > { %1031 = vmatmul.mubr.msk.bf16.gmra.mrb[4].mxu0 %vm429_vm0, %v1085_v7 }
  0xe5   : > { %v1028_v12 = vpop.f32.mrb[0].mxu0 }
  0xe6   : > { %v485_v13 = vadd.f32 %v1028_v12, %v962_v11  ;;  %v476_v14 = vpop.f32.mrb[1].mxu0 }
  0xe7   : > { %v477_v15 = vadd.f32 %v962_v11, %v476_v14  ;;  %v1029_v16 = vpop.f32.mrb[2].mxu0 }
  0xe8   : > { %v488_v17 = vadd.f32 %v1029_v16, %v962_v11  ;;  %v479_v18 = vpop.f32.mrb[3].mxu0  ;;  %v509_v20 = vmax.f32 %v485_v13, 0.0 }
  0xe9   : > { %v480_v19 = vadd.f32 %v962_v11, %v479_v18  ;;  %v507_v22 = vmax.f32 %v477_v15, 0.0 }
  0xea   : > { %v510_v21 = vmax.f32 %v488_v17, 0.0 }
  0xeb   : > { %v508_v23 = vmax.f32 %v480_v19, 0.0 }
  0xec   : > { %v516_v24 = vpack.c.bf16 %v510_v21, %v509_v20 }
  0xed   : > { %v1032_v25 = vpop.f32.mrb[4].mxu0  ;;  %v515_v26 = vpack.c.bf16 %v508_v23, %v507_v22 }
  0xee   : > { %v501_v27 = vadd.f32 %v1032_v25, %v962_v11  ;;  %v492_v28 = vpop.f32.mrb[5].mxu0 }
  0xef   : > { %v493_v29 = vadd.f32 %v962_v11, %v492_v28  ;;  %v1033_v30 = vpop.f32.mrb[6].mxu0  ;;  %1042 = vmatprep.mubr.msk.bf16.mxu1 %vm558_vm1, %v515_v26  ;;  %v989_v28 = vld [vmem:[%s1263_s8] ss:$0 sm:$0xff] }
  0xf0   : > { %v504_v31 = vadd.f32 %v1033_v30, %v962_v11  ;;  %v495_v32 = vpop.f32.mrb[7].mxu0  ;;  %1043 = vmatmul.mubr.msk.bf16.vlgmr.msra.gmra.mrb[0].mxu1 %vm558_vm1, %v516_v24  ;;  %v513_v34 = vmax.f32 %v501_v27, 0.0 }
  0xf1   : > { %v496_v33 = vadd.f32 %v962_v11, %v495_v32  ;;  %v511_v36 = vmax.f32 %v493_v29, 0.0  ;;  %1063 = vmatpush3.bf16.msra.mxu1 %v1092_v41 }
  0xf2   : > { %v514_v35 = vmax.f32 %v504_v31, 0.0 }
  0xf3   : > { %v512_v37 = vmax.f32 %v496_v33, 0.0 }
  0xf4   : > { %v518_v38 = vpack.c.bf16 %v514_v35, %v513_v34 }
  0xf5   : > { %v517_v39 = vpack.c.bf16 %v512_v37, %v511_v36 }
  0xf7   : > { %1046 = vmatprep.mubr.msk.bf16.mxu1 %vm558_vm1, %v517_v39 }
  0xf8   : > { %1047 = vmatmul.mubr.msk.bf16.gmra.mrb[4].mxu1 %vm558_vm1, %v518_v38 }
 0x1c3   : > { %v1044_v43 = vpop.f32.mrb[0].mxu1 }
 0x1c4   : > { %v614_v44 = vadd.f32 %v1044_v43, %v973_v42  ;;  %v605_v45 = vpop.f32.mrb[1].mxu1 }
 0x1c5   : > { %v606_v46 = vadd.f32 %v973_v42, %v605_v45  ;;  %v1045_v47 = vpop.f32.mrb[2].mxu1 }
 0x1c6   : > { %638 = vst.msk [vmem:[%s369_s27 + $0x10] sm:$0xff] %vm429_vm0, %v614_v44  ;;  %v617_v48 = vadd.f32 %v1045_v47, %v973_v42  ;;  %v608_v49 = vpop.f32.mrb[3].mxu1 }
 0x1c7   : > { %636 = vst.msk [vmem:[%s369_s27] sm:$0xff] %vm429_vm0, %v606_v46  ;;  %v609_v50 = vadd.f32 %v973_v42, %v608_v49 }
 0x1c8   : > { %639 = vst.msk [vmem:[%s369_s27 + $0x18] sm:$0xff] %vm429_vm0, %v617_v48  ;;  %v645_v51 = vpack.c.bf16 %v617_v48, %v614_v44 }
 0x1c9   : > { %637 = vst.msk [vmem:[%s369_s27 + $0x8] sm:$0xff] %vm429_vm0, %v609_v50  ;;  %v644_v52 = vpack.c.bf16 %v609_v50, %v606_v46 }
 0x1cb   : > { %v1048_v53 = vpop.f32.mrb[4].mxu1  ;;  %1054 = vmatprep.mubr.msk.bf16.mxu0 %vm429_vm0, %v644_v52 }
 0x1cc   : > { %v630_v54 = vadd.f32 %v1048_v53, %v973_v42  ;;  %v621_v55 = vpop.f32.mrb[5].mxu1  ;;  %1055 = vmatmul.mubr.msk.bf16.vlgmr.msra.gmra.mrb[8].mxu0 %vm429_vm0, %v645_v51 }
 0x1cd   : > { %v622_v56 = vadd.f32 %v973_v42, %v621_v55  ;;  %v1049_v57 = vpop.f32.mrb[6].mxu1 }
 0x1ce   : > { %642 = vst.msk [vmem:[%s369_s27 + $0x30] sm:$0xff] %vm429_vm0, %v630_v54  ;;  %v633_v58 = vadd.f32 %v1049_v57, %v973_v42  ;;  %v624_v59 = vpop.f32.mrb[7].mxu1 }
 0x1cf   : > { %640 = vst.msk [vmem:[%s369_s27 + $0x20] sm:$0xff] %vm429_vm0, %v622_v56  ;;  %v625_v60 = vadd.f32 %v973_v42, %v624_v59 }
 0x1d0   : > { %643 = vst.msk [vmem:[%s369_s27 + $0x38] sm:$0xff] %vm429_vm0, %v633_v58  ;;  %v647_v61 = vpack.c.bf16 %v633_v58, %v630_v54 }
 0x1d1   : > { %641 = vst.msk [vmem:[%s369_s27 + $0x28] sm:$0xff] %vm429_vm0, %v625_v60  ;;  %v646_v62 = vpack.c.bf16 %v625_v60, %v622_v56 }
 0x1d3   : > { %1058 = vmatprep.mubr.msk.bf16.mxu0 %vm429_vm0, %v646_v62 }
 0x1d4   : > { %1059 = vmatmul.mubr.msk.bf16.gmra.mrb[12].mxu0 %vm429_vm0, %v647_v61 }
 0x29f   : > { %v1056_v0 = vpop.f32.mrb[8].mxu0 }
 0x2a0   : > { %v726_v1 = vadd.f32 %v1056_v0, %v982_v63  ;;  %v717_v2 = vpop.f32.mrb[9].mxu0 }
 0x2a1   : > { %v718_v3 = vadd.f32 %v982_v63, %v717_v2  ;;  %v1057_v4 = vpop.f32.mrb[10].mxu0 }
 0x2a2   : > { %v729_v5 = vadd.f32 %v1057_v4, %v982_v63  ;;  %v720_v6 = vpop.f32.mrb[11].mxu0  ;;  %v750_v8 = vmax.f32 %v726_v1, 0.0 }
 0x2a3   : > { %v721_v7 = vadd.f32 %v982_v63, %v720_v6  ;;  %v748_v10 = vmax.f32 %v718_v3, 0.0 }
 0x2a4   : > { %v751_v9 = vmax.f32 %v729_v5, 0.0 }
 0x2a5   : > { %v749_v11 = vmax.f32 %v721_v7, 0.0 }
 0x2a6   : > { %v757_v12 = vpack.c.bf16 %v751_v9, %v750_v8 }
 0x2a7   : > { %v756_v13 = vpack.c.bf16 %v749_v11, %v748_v10  ;;  %v1060_v14 = vpop.f32.mrb[12].mxu0 }
 0x2a8   : > { %v742_v15 = vadd.f32 %v1060_v14, %v982_v63  ;;  %v733_v16 = vpop.f32.mrb[13].mxu0 }
 0x2a9   : > { %v734_v17 = vadd.f32 %v982_v63, %v733_v16  ;;  %v1061_v18 = vpop.f32.mrb[14].mxu0  ;;  %1064 = vmatprep.mubr.msk.bf16.mxu1 %vm775_vm2, %v756_v13 }
 0x2aa   : > { %v745_v19 = vadd.f32 %v1061_v18, %v982_v63  ;;  %v736_v20 = vpop.f32.mrb[15].mxu0  ;;  %1065 = vmatmul.mubr.msk.bf16.vlgmr.msra.gmra.mrb[8].mxu1 %vm775_vm2, %v757_v12  ;;  %v754_v22 = vmax.f32 %v742_v15, 0.0 }
 0x2ab   : > { %v737_v21 = vadd.f32 %v982_v63, %v736_v20  ;;  %v752_v24 = vmax.f32 %v734_v17, 0.0 }
 0x2ac   : > { %v755_v23 = vmax.f32 %v745_v19, 0.0 }
 0x2ad   : > { %v753_v25 = vmax.f32 %v737_v21, 0.0 }
 0x2ae   : > { %v759_v26 = vpack.c.bf16 %v755_v23, %v754_v22 }
 0x2af   : > { %v758_v27 = vpack.c.bf16 %v753_v25, %v752_v24 }
 0x2b1   : > { %1068 = vmatprep.mubr.msk.bf16.mxu1 %vm775_vm2, %v758_v27 }
 0x2b2   : > { %1069 = vmatmul.mubr.msk.bf16.gmra.mrb[12].mxu1 %vm775_vm2, %v759_v26 }
 0x37d   : > { %v1066_v29 = vpop.f32.mrb[8].mxu1 }
 0x37e   : > { %v831_v30 = vadd.f32 %v1066_v29, %v989_v28  ;;  %v822_v31 = vpop.f32.mrb[9].mxu1 }
 0x37f   : > { %v823_v32 = vadd.f32 %v989_v28, %v822_v31  ;;  %v1067_v33 = vpop.f32.mrb[10].mxu1 }
 0x380   : > { %855 = vst.msk [vmem:[%s375_s15 + $0x10] sm:$0xff] %vm429_vm0, %v831_v30  ;;  %v834_v34 = vadd.f32 %v1067_v33, %v989_v28  ;;  %v825_v35 = vpop.f32.mrb[11].mxu1 }
 0x381   : > { %853 = vst.msk [vmem:[%s375_s15] sm:$0xff] %vm429_vm0, %v823_v32  ;;  %v826_v36 = vadd.f32 %v989_v28, %v825_v35 }
 0x382   : > { %856 = vst.msk [vmem:[%s375_s15 + $0x18] sm:$0xff] %vm429_vm0, %v834_v34 }
 0x383   : > { %854 = vst.msk [vmem:[%s375_s15 + $0x8] sm:$0xff] %vm429_vm0, %v826_v36 }
 0x385   : > { %v1070_v37 = vpop.f32.mrb[12].mxu1 }
 0x386   : > { %v847_v38 = vadd.f32 %v1070_v37, %v989_v28  ;;  %v838_v39 = vpop.f32.mrb[13].mxu1 }
 0x387   : > { %v839_v40 = vadd.f32 %v989_v28, %v838_v39  ;;  %v1071_v41 = vpop.f32.mrb[14].mxu1 }
 0x388   : > { %859 = vst.msk [vmem:[%s375_s15 + $0x30] sm:$0xff] %vm429_vm0, %v847_v38  ;;  %v850_v42 = vadd.f32 %v1071_v41, %v989_v28  ;;  %v841_v43 = vpop.f32.mrb[15].mxu1 }
 0x389   : > { %857 = vst.msk [vmem:[%s375_s15 + $0x20] sm:$0xff] %vm429_vm0, %v839_v40  ;;  %v842_v44 = vadd.f32 %v989_v28, %v841_v43 }
 0x38a   : > { %860 = vst.msk [vmem:[%s375_s15 + $0x38] sm:$0xff] %vm429_vm0, %v850_v42 }
 0x38b   : > { %858 = vst.msk [vmem:[%s375_s15 + $0x28] sm:$0xff] %vm429_vm0, %v842_v44 }
 0x38c PF: > { %s21_s13 = sadd.s32 1, %s1099_s13  }
 0x38d   : > { %p18_p4 = scmp.ge.s32.totalorder %s21_s13, 4  }
 0x38f   :  { %20 = sbr.rel (!%p18_p4) target bundleno = 1 (0x1), region = 98 }

</bundles_post_ra>
